<compile_context>
chip_gen: v5e
topology: v5e:2x2
jax: 0.10.0
libtpu: 0.0.40
codegen_flags: <defaults>
</compile_context>

<pallas_src>
import functools
import math

import jax
import jax.numpy as jnp
from jax.experimental import pallas as pl
from jax.experimental.pallas import tpu as pltpu

LANE = 128
SUB = 8
MAX_BATCH_TILE = 2048
FUSE_TANH_MAX_BATCH = 1024  # below this, fuse tanh in-kernel (latency path)


def _actor_kernel(x_ref, w1_ref, b1_ref, w2_ref, b2_ref, out_ref, *,
                  max_angle, action_s, input_s, fuse_tanh):
    x = x_ref[...]  # (TB, input_s) f32

    # Layer 1: x @ W1 + b1, ReLU.
    if input_s == 1:
        # Degenerate K=1 matmul -> VPU broadcast multiply (frees the MXU path).
        h = x * w1_ref[...] + b1_ref[...]          # (TB,1)*(1,Hp) -> (TB,Hp)
    else:
        h = jnp.dot(x, w1_ref[...],
                    preferred_element_type=jnp.float32) + b1_ref[...]
    h = jnp.maximum(h, 0.0)

    # Layer 2: single fused matmul producing [mu | log_std | pad] lanes.
    out = jnp.dot(h, w2_ref[...],
                  preferred_element_type=jnp.float32) + b2_ref[...]

    if fuse_tanh:
        # tanh(mu) * max_angle on the mu lanes only; log_std lanes pass through.
        lane = jax.lax.broadcasted_iota(jnp.int32, out.shape, dimension=1)
        out = jnp.where(lane < action_s, jnp.tanh(out) * max_angle, out)

    out_ref[...] = out


def init_actor_params(key, input_s=1, hidden_size=56, action_s=2):
    """Matches Actor.small_weight_init: Normal(0, 0.1) for weights and biases.

    Weights stored as (in_features, out_features) (transposed vs PyTorch).
    """
    k1, k2, k3, k4 = jax.random.split(key, 4)
    out2 = action_s * 2  # learn_std=True
    return {
        "w1": 0.1 * jax.random.normal(k1, (input_s, hidden_size), jnp.float32),
        "b1": 0.1 * jax.random.normal(k2, (hidden_size,), jnp.float32),
        "w2": 0.1 * jax.random.normal(k3, (hidden_size, out2), jnp.float32),
        "b2": 0.1 * jax.random.normal(k4, (out2,), jnp.float32),
    }


def prepare_actor_params(params, *, action_s=2):
    """One-time padding of the weights into TPU-friendly f32 slabs (reuse per call).

    Only arrays go into the returned dict (it is a jit pytree argument); all
    dimensions are re-derived from shapes inside actor_forward.
    """
    w1, b1, w2, b2 = params["w1"], params["b1"], params["w2"], params["b2"]
    input_s, hidden = w1.shape
    out2 = w2.shape[1]
    assert out2 == 2 * action_s, "w2 output dim must be 2*action_s (learn_std=True)"
    assert out2 <= LANE, "fused [mu|log_std] slab assumes 2*action_s <= 128 lanes"

    Hp = ((hidden + LANE - 1) // LANE) * LANE  # hidden padded to 128 lanes
    Op = LANE                                  # fused [mu|log_std|pad] output lanes

    def pad2(a, rows, cols):
        out = jnp.zeros((rows, cols), dtype=jnp.float32)
        return out.at[: a.shape[0], : a.shape[1]].set(a.astype(jnp.float32))

    return {
        "w1_p": pad2(w1, input_s, Hp),               # (input_s, Hp)
        "b1_p": pad2(b1.reshape(1, -1), 1, Hp),      # (1, Hp)
        "w2_p": pad2(w2, Hp, Op),                    # (Hp, 128)
        "b2_p": pad2(b2.reshape(1, -1), 1, Op),      # (1, 128)
    }


def _choose_batch_tile(B):
    """Pick batch tile: big tiles (per-step overhead dominates), but >=2 tiles
    for larger batches so v7x's two TensorCores both get work."""
    if B <= 2 * SUB:
        return B                                  # single full-extent tile
    half = -(-B // 2)                             # ceil(B/2)
    half = -(-half // SUB) * SUB                  # round up to sublane multiple
    return min(MAX_BATCH_TILE, half)


@functools.partial(jax.jit, static_argnames=("action_s", "max_angle"))
def actor_forward(x, padded, *, action_s=2, max_angle=math.pi):
    """Pallas implementation of Actor.forward (learn_std=True).

    x: (B, input_s) float32
    padded: output of prepare_actor_params()
    returns (tanh(mu) * max_angle, log_std), each (B, action_s) float32
    """
    B, input_s = x.shape
    w1_p, b1_p, w2_p, b2_p = (padded["w1_p"], padded["b1_p"],
                              padded["w2_p"], padded["b2_p"])
    Hp, Op = w2_p.shape                      # static (from array shapes)
    assert w1_p.shape == (input_s, Hp)
    assert 2 * action_s <= Op

    TB = _choose_batch_tile(B)
    grid = (pl.cdiv(B, TB),)                 # ragged last tile handled by Pallas
    fuse_tanh = B <= FUSE_TANH_MAX_BATCH     # static (shape-derived)

    kernel = functools.partial(_actor_kernel, max_angle=max_angle,
                               action_s=action_s, input_s=input_s,
                               fuse_tanh=fuse_tanh)

    out_p = pl.pallas_call(
        kernel,
        out_shape=jax.ShapeDtypeStruct((B, Op), jnp.float32),
        grid=grid,
        in_specs=[
            pl.BlockSpec((TB, input_s), lambda i: (i, 0)),   # x tile (pipelined)
            pl.BlockSpec((input_s, Hp), lambda i: (0, 0)),   # weights stay VMEM-resident
            pl.BlockSpec((1, Hp), lambda i: (0, 0)),
            pl.BlockSpec((Hp, Op), lambda i: (0, 0)),
            pl.BlockSpec((1, Op), lambda i: (0, 0)),
        ],
        out_specs=pl.BlockSpec((TB, Op), lambda i: (i, 0)),
        compiler_params=pltpu.CompilerParams(
            dimension_semantics=("parallel",)),
    )(x.astype(jnp.float32), w1_p, b1_p, w2_p, b2_p)

    mu = out_p[:, :action_s]
    log_std = out_p[:, action_s:2 * action_s]
    if not fuse_tanh:
        # Large-batch path: apply tanh on the sliced (B, action_s) mu instead of
        # pushing (B, 128) lanes through the single EUP inside the kernel.
        mu = jnp.tanh(mu) * max_angle
    return mu, log_std


def _reference_forward(x, params, *, action_s=2, max_angle=math.pi):
    h = jnp.maximum(x @ params["w1"] + params["b1"], 0.0)
    out = h @ params["w2"] + params["b2"]
    mu = out[..., :action_s]
    ls = out[..., action_s:]
    return jnp.tanh(mu) * max_angle, ls


# TODO(synk): Adam optimizer / lr scheduler / computeAction sampling utilities are
# training-side PyTorch machinery, not part of the forward pass, and are not ported.

if __name__ == "__main__":
    key = jax.random.PRNGKey(0)
    pkey, xkey = jax.random.split(key)

    input_s, hidden_size, action_s = 1, 56, 2
    params = init_actor_params(pkey, input_s=input_s,
                               hidden_size=hidden_size, action_s=action_s)
    padded = prepare_actor_params(params, action_s=action_s)  # one-time padding

    batch = 2
    x = jax.random.normal(xkey, (batch, input_s), jnp.float32)

    mu, log_std = actor_forward(x, padded, action_s=action_s, max_angle=math.pi)
    mu = jax.block_until_ready(mu)
    log_std = jax.block_until_ready(log_std)

    mu_ref, ls_ref = _reference_forward(x, params, action_s=action_s,
                                        max_angle=math.pi)
    assert mu.shape == (batch, action_s) and log_std.shape == (batch, action_s)
    # f32 weights; MXU may internally use bf16 passes for the K=128 dot -> ~5e-3 budget.
    assert jnp.allclose(mu, mu_ref, atol=5e-3, rtol=5e-3)
    assert jnp.allclose(log_std, ls_ref, atol=5e-3, rtol=5e-3)

    print("KERNEL_OK")
</pallas_src>

<mosaic_0001>
module attributes {stable_mosaic.version = 11 : i64} {
  func.func @_actor_kernel(%arg0: i32, %arg1: memref<2x1xf32, #tpu.memory_space<vmem>>, %arg2: memref<1x128xf32, #tpu.memory_space<vmem>>, %arg3: memref<1x128xf32, #tpu.memory_space<vmem>>, %arg4: memref<128x128xf32, #tpu.memory_space<vmem>>, %arg5: memref<1x128xf32, #tpu.memory_space<vmem>>, %arg6: memref<2x128xf32, #tpu.memory_space<vmem>>) attributes {dimension_semantics = [#tpu.dimension_semantics<parallel>], iteration_bounds = array<i64: 1>, scalar_prefetch = 0 : i64, scratch_operands = 0 : i64, tpu.core_type = #tpu.core_type<tc>, window_params = [{transform_indices = @transform_0, window_bounds = array<i64: 2, 1>}, {pipeline_mode = #tpu.pipeline_mode<synchronous>, transform_indices = @transform_1, window_bounds = array<i64: 1, 128>}, {pipeline_mode = #tpu.pipeline_mode<synchronous>, transform_indices = @transform_2, window_bounds = array<i64: 1, 128>}, {pipeline_mode = #tpu.pipeline_mode<synchronous>, transform_indices = @transform_3, window_bounds = array<i64: 128, 128>}, {pipeline_mode = #tpu.pipeline_mode<synchronous>, transform_indices = @transform_4, window_bounds = array<i64: 1, 128>}, {transform_indices = @transform_5, window_bounds = array<i64: 2, 128>}]} {
    %c0 = arith.constant 0 : index
    %c0_0 = arith.constant 0 : index
    %0 = vector.load %arg1[%c0, %c0_0] : memref<2x1xf32, #tpu.memory_space<vmem>>, vector<2x1xf32>
    %c0_1 = arith.constant 0 : index
    %c0_2 = arith.constant 0 : index
    %1 = vector.load %arg2[%c0_1, %c0_2] : memref<1x128xf32, #tpu.memory_space<vmem>>, vector<1x128xf32>
    %2 = vector.broadcast %0 : vector<2x1xf32> to vector<2x128xf32>
    %3 = vector.broadcast %1 : vector<1x128xf32> to vector<2x128xf32>
    %4 = arith.mulf %2, %3 : vector<2x128xf32>
    %c0_3 = arith.constant 0 : index
    %c0_4 = arith.constant 0 : index
    %5 = vector.load %arg3[%c0_3, %c0_4] : memref<1x128xf32, #tpu.memory_space<vmem>>, vector<1x128xf32>
    %6 = vector.broadcast %5 : vector<1x128xf32> to vector<2x128xf32>
    %7 = arith.addf %4, %6 : vector<2x128xf32>
    %cst = arith.constant 0.000000e+00 : f32
    %8 = vector.broadcast %cst : f32 to vector<2x128xf32>
    %9 = arith.maximumf %7, %8 : vector<2x128xf32>
    %c0_5 = arith.constant 0 : index
    %c0_6 = arith.constant 0 : index
    %10 = vector.load %arg4[%c0_5, %c0_6] : memref<128x128xf32, #tpu.memory_space<vmem>>, vector<128x128xf32>
    %cst_7 = arith.constant dense<0.000000e+00> : vector<2x128xf32>
    %11 = tpu.matmul %9, %10, %cst_7 {dimension_numbers = #tpu.dot_dimension_numbers<[1], [0], [0], [1], [0, 0, 1, 1], [], []>} : vector<2x128xf32>, vector<128x128xf32>, vector<2x128xf32> -> vector<2x128xf32>
    %c0_8 = arith.constant 0 : index
    %c0_9 = arith.constant 0 : index
    %12 = vector.load %arg5[%c0_8, %c0_9] : memref<1x128xf32, #tpu.memory_space<vmem>>, vector<1x128xf32>
    %13 = vector.broadcast %12 : vector<1x128xf32> to vector<2x128xf32>
    %14 = arith.addf %11, %13 : vector<2x128xf32>
    %15 = tpu.iota {dimensions = array<i32: 1>} : vector<2x128xi32>
    %c2_i32 = arith.constant 2 : i32
    %16 = vector.broadcast %c2_i32 : i32 to vector<2x128xi32>
    %17 = arith.cmpi slt, %15, %16 : vector<2x128xi32>
    %18 = math.tanh %14 : vector<2x128xf32>
    %cst_10 = arith.constant 3.14159274 : f32
    %19 = vector.broadcast %cst_10 : f32 to vector<2x128xf32>
    %20 = arith.mulf %18, %19 : vector<2x128xf32>
    %21 = arith.select %17, %20, %14 : vector<2x128xi1>, vector<2x128xf32>
    %c0_11 = arith.constant 0 : index
    %c0_12 = arith.constant 0 : index
    %22 = vector.load %arg6[%c0_11, %c0_12] : memref<2x128xf32, #tpu.memory_space<vmem>>, vector<2x128xf32>
    tpu.vector_store %arg6[%c0_11, %c0_12], %21 {strides = array<i32>} : memref<2x128xf32, #tpu.memory_space<vmem>>, vector<2x128xf32>,
    return
  }
  func.func @transform_0(%arg0: i32) -> (i32, i32) {
    %c0_i32 = arith.constant 0 : i32
    %c0_i32_0 = arith.constant 0 : i32
    return %arg0, %c0_i32 : i32, i32
  }
  func.func @transform_1(%arg0: i32) -> (i32, i32) {
    %c0_i32 = arith.constant 0 : i32
    %c0_i32_0 = arith.constant 0 : i32
    %c0_i32_1 = arith.constant 0 : i32
    return %c0_i32, %c0_i32_0 : i32, i32
  }
  func.func @transform_2(%arg0: i32) -> (i32, i32) {
    %c0_i32 = arith.constant 0 : i32
    %c0_i32_0 = arith.constant 0 : i32
    %c0_i32_1 = arith.constant 0 : i32
    return %c0_i32, %c0_i32_0 : i32, i32
  }
  func.func @transform_3(%arg0: i32) -> (i32, i32) {
    %c0_i32 = arith.constant 0 : i32
    %c0_i32_0 = arith.constant 0 : i32
    %c0_i32_1 = arith.constant 0 : i32
    return %c0_i32, %c0_i32_0 : i32, i32
  }
  func.func @transform_4(%arg0: i32) -> (i32, i32) {
    %c0_i32 = arith.constant 0 : i32
    %c0_i32_0 = arith.constant 0 : i32
    %c0_i32_1 = arith.constant 0 : i32
    return %c0_i32, %c0_i32_0 : i32, i32
  }
  func.func @transform_5(%arg0: i32) -> (i32, i32) {
    %c0_i32 = arith.constant 0 : i32
    %c0_i32_0 = arith.constant 0 : i32
    return %arg0, %c0_i32 : i32, i32
  }
}

</mosaic_0001>

<bundles_post_ra>
// kernel: actor_forward.1
= control target key start
LH: loop header
LB: loop body
LE: loop exit
PB: predicated region body
PF: predicated region fallthrough
CT: control target
= control target key end

     0   :  { %10 = vsyncpa [#allocation3], 0  ;;  %s141_s21 = smov [#allocation2]   ;;  %s142_s23 = smov 128   ;;  %s193_s0 = inlined_call_operand.vmem [shape: f32[2,1], index: 0, kind: input, shape index: {}]   ;;  %s194_s1 = inlined_call_operand.vmem [shape: f32[1,128], index: 1, kind: input, shape index: {}]   ;;  %s195_s2 = inlined_call_operand.vmem [shape: f32[1,128], index: 2, kind: input, shape index: {}]   ;;  %s196_s3 = inlined_call_operand.hbm [shape: f32[128,128], index: 3, kind: input, shape index: {}]   ;;  %s197_s4 = inlined_call_operand.vmem [shape: f32[1,128], index: 4, kind: input, shape index: {}]   ;;  %s198_s5 = inlined_call_operand.vmem [shape: f32[2,128], index: 5, kind: output, shape index: {}]  }
   0x1   :  { %s21_s20 = sshll.u32 %s196_s3, 4  ;;  %s23_s22 = sshll.u32 %s141_s21, 4  ;;  %s22_s20 = int_to_ptr.hbm [resolvable:$true] %s21_s20  ;;  %s24_s22 = int_to_ptr.vmem [resolvable:$true] %s23_s22 }
   0x2   :  { %s143_s24 = smov 8  }
   0x3   :  { %29 = dma.hbm_to_vmem [thread:$0]  %s22_s20, 2048, %s24_s22, [#allocation3], %s142_s23, %s142_s23, %s143_s24  }
   0x4   :  { %139 = dma.done.wait [#allocation3], 2048  }
   0x5   :  { %140 = vsyncadd [#allocation3], 4294965248  ;;  %v144_v0 = vmov 0   ;;  %v36_v1 = vld [vmem:[%s193_s0] sm:$0x3]  ;;  %v68_v2 = vld [vmem:[#allocation2 + $0x78] sm:$0xff]  ;;  %v93_v27 = vlaneseq }
   0x6   :  { %109 = vset.pattern.permute.xlu0 %v144_v0  ;;  %v67_v3 = vld [vmem:[#allocation2 + $0x70] sm:$0xff]  ;;  %73 = vmatpush.msra.mxu0 %v68_v2  ;;  %v66_v4 = vld [vmem:[#allocation2 + $0x68] sm:$0xff]  ;;  %v65_v5 = vld [vmem:[#allocation2 + $0x60] sm:$0xff] }
   0x7   :  { %40 = vperm.xlu0 %109, %v36_v1   ;;  %v64_v6 = vld [vmem:[#allocation2 + $0x58] sm:$0xff]  ;;  %v63_v7 = vld [vmem:[#allocation2 + $0x50] sm:$0xff]  ;;  %v62_v8 = vld [vmem:[#allocation2 + $0x48] sm:$0xff]  ;;  %v94_v28 = vand.u32 127, %v93_v27 }
   0x8   :  { %74 = vmatpush.msra.mxu0 %v67_v3  ;;  %v61_v9 = vld [vmem:[#allocation2 + $0x40] sm:$0xff]  ;;  %v60_v10 = vld [vmem:[#allocation2 + $0x38] sm:$0xff]  ;;  %v59_v11 = vld [vmem:[#allocation2 + $0x30] sm:$0xff] }
   0x9   :  { %v58_v12 = vld [vmem:[#allocation2 + $0x28] sm:$0xff]  ;;  %v57_v13 = vld [vmem:[#allocation2 + $0x20] sm:$0xff]  ;;  %v56_v14 = vld [vmem:[#allocation2 + $0x18] sm:$0xff]  ;;  %vm95_vm0 = vcmp.lt.s32.totalorder %v94_v28, 2 }
   0xa   :  { %75 = vmatpush.msra.mxu0 %v66_v4  ;;  %v55_v15 = vld [vmem:[#allocation2 + $0x10] sm:$0xff]  ;;  %v54_v16 = vld [vmem:[#allocation2 + $0x8] sm:$0xff]  ;;  %v53_v17 = vld [vmem:[#allocation2] sm:$0xff] }
   0xb   :  { %v110_v18 = vld [vmem:[%s194_s1] ss:$0 sm:$0xff] }
   0xc   :  { %76 = vmatpush.msra.mxu0 %v65_v5  ;;  %v111_v19 = vld [vmem:[%s195_s2] ss:$0 sm:$0xff] }
   0xd   :  { %v112_v24 = vld [vmem:[%s197_s4] ss:$0 sm:$0xff] }
   0xe   :  { %77 = vmatpush.msra.mxu0 %v64_v6 }
  0x10   :  { %78 = vmatpush.msra.mxu0 %v63_v7 }
  0x12   :  { %79 = vmatpush.msra.mxu0 %v62_v8 }
  0x14   :  { %80 = vmatpush.msra.mxu0 %v61_v9 }
  0x16   :  { %81 = vmatpush.msra.mxu0 %v60_v10 }
  0x18   :  { %82 = vmatpush.msra.mxu0 %v59_v11 }
  0x1a   :  { %83 = vmatpush.msra.mxu0 %v58_v12 }
  0x1c   :  { %84 = vmatpush.msra.mxu0 %v57_v13 }
  0x1e   :  { %85 = vmatpush.msra.mxu0 %v56_v14 }
  0x20   :  { %86 = vmatpush.msra.mxu0 %v55_v15 }
  0x22   :  { %87 = vmatpush.msra.mxu0 %v54_v16 }
  0x24   :  { %88 = vmatpush.msra.mxu0 %v53_v17 }
  0x79   :  { %v41_v20 = vpop.permute.xlu0 %40 }
  0x7a   :  { %v46_v21 = vmul.f32 %v110_v18, %v41_v20 }
  0x7c   :  { %v51_v22 = vadd.f32 %v111_v19, %v46_v21 }
  0x7e   :  { %v52_v23 = vmax.f32 %v51_v22, 0.0 }
  0x80   :  { %89 = vmatmul.f32.vlgmr.msra.gmra.mxu0 %v52_v23 }
  0xfd   :  { %v90_v25 = vpop.f32.mrf.mxu0 }
  0xfe   :  { %v91_v26 = vadd.f32 %v112_v24, %v90_v25 }
 0x100   :  { %113 = vtanh.f32 %v91_v26 }
 0x106   :  { %v114_v29 = vpop.eup %113 }
 0x107   :  { %v97_v30 = vmul.f32 3.1415927, %v114_v29 }
 0x109   :  { %v98_v31 = vsel %vm95_vm0, %v97_v30, %v91_v26 }
 0x10a   :  { %99 = vst [vmem:[%s198_s5] sm:$0x3] %v98_v31 }
 0x10b   :  { %104 = vsyncpa [#allocation3], 1 }

</bundles_post_ra>
